<compile_context>
chip_gen: v5e
topology: v5e:2x2
jax: 0.10.0
libtpu: 0.0.40
codegen_flags: <defaults>
</compile_context>

<pallas_src>
import functools

import jax
import jax.numpy as jnp
from jax.experimental import pallas as pl
from jax.experimental.pallas import tpu as pltpu

LANES = 128
# Below this many elements a plain-JAX reduce beats kernel-launch overhead.
_SMALL_INPUT_ELEMS = 1024
# ~4 MiB per input block (perf review); tile_rows scales with 1/itemsize.
_TARGET_BLOCK_BYTES = 4 * 1024 * 1024
# 2 inputs x 2 pipeline buffers x ~4 MiB = ~16 MiB working set. 32 MiB raises
# v5e's 16 MiB scoped default, matches v6e/v7x defaults, fits all physical VMEM.
_VMEM_LIMIT_BYTES = 32 * 1024 * 1024


def _round_up(x, m):
    return ((x + m - 1) // m) * m


def _default_num_partials():
    """2 partial accumulators only on chips that shard the 'parallel' grid axis
    across two TensorCores; 1 on single-TC chips (v5e/v6e)."""
    try:
        kind = jax.devices()[0].device_kind.lower()
    except Exception:
        return 1
    return 2 if any(tag in kind for tag in ("v7", "7x", "v4", "v5p")) else 1


def _mae_partial_kernel(p_ref, t_ref, acc_ref, *, tile_rows, tiles_per_core,
                        total_rows, apply_mask):
    """Accumulate sum(|p - t|) over this core's row tiles into acc_ref.

    acc_ref: (1, 8, 128) f32 output block whose block index is constant along
    the trailing ("arbitrary") grid axis, so it stays resident in VMEM and
    acts as a per-core accumulator.
    """
    @pl.when(pl.program_id(1) == 0)
    def _():
        acc_ref[...] = jnp.zeros_like(acc_ref)

    absdiff = jnp.abs(p_ref[...].astype(jnp.float32)
                      - t_ref[...].astype(jnp.float32))

    def accumulate(x):
        # (tr, 128) -> (tr//8, 8, 128): summing over axis 0 is a stack of
        # vreg-wise VPU adds (no per-step cross-lane XLU work).
        acc_ref[...] += jnp.sum(x.reshape(tile_rows // 8, 8, LANES), axis=0)[None]

    if apply_mask:
        # Mask is only ever needed on the boundary tile (or clamped, re-read
        # tiles where rows_remaining <= 0); gate it so interior tiles skip the
        # iota + compare + select entirely.
        tile_idx = pl.program_id(0) * tiles_per_core + pl.program_id(1)
        rows_remaining = total_rows - tile_idx * tile_rows
        is_boundary = rows_remaining < tile_rows

        @pl.when(jnp.logical_not(is_boundary))
        def _():
            accumulate(absdiff)

        @pl.when(is_boundary)
        def _():
            row_ids = jax.lax.broadcasted_iota(jnp.int32, (tile_rows, LANES), 0)
            accumulate(jnp.where(row_ids < rows_remaining, absdiff, 0.0))
    else:
        accumulate(absdiff)


@functools.partial(jax.jit, static_argnames=("tile_rows", "num_partials"))
def mae_loss(pred, target, *, tile_rows=None, num_partials=None):
    """mean(|pred - target|), accumulated in f32 (MAELoss.forward)."""
    assert pred.shape == target.shape, "pred/target shape mismatch"
    n_elem = pred.size

    # Small-input fast path: launch + reshape overhead would dominate.
    if n_elem < _SMALL_INPUT_ELEMS:
        diff = pred.astype(jnp.float32) - target.astype(jnp.float32)
        return jnp.mean(jnp.abs(diff)).astype(jnp.float32)

    if num_partials is None:
        num_partials = _default_num_partials()

    p_flat = jnp.ravel(pred)
    t_flat = jnp.ravel(target)

    rows = n_elem // LANES          # >= 8 given the small-input threshold
    n_main = rows * LANES
    tail = n_elem - n_main

    if tail:
        # Ragged tail (< 128 elements) reduced in plain JAX; no whole-array
        # jnp.pad in HBM.
        tail_sum = jnp.sum(jnp.abs(p_flat[n_main:].astype(jnp.float32)
                                   - t_flat[n_main:].astype(jnp.float32)))
        p_flat = p_flat[:n_main]
        t_flat = t_flat[:n_main]
    else:
        tail_sum = jnp.float32(0.0)

    p2d = p_flat.reshape(rows, LANES)
    t2d = t_flat.reshape(rows, LANES)

    # Block sizing: ~4 MiB per input block, rows kept a multiple of 16 so
    # bf16 inputs (upcast per-tile inside the kernel) pack cleanly too.
    itemsize = max(p2d.dtype.itemsize, t2d.dtype.itemsize)
    if tile_rows is None:
        tile_rows = max(16, _TARGET_BLOCK_BYTES // (LANES * itemsize))
    tr = min(_round_up(tile_rows, 16), _round_up(rows, 16))

    num_tiles = pl.cdiv(rows, tr)
    num_p = max(1, min(num_partials, num_tiles))
    tiles_per_core = pl.cdiv(num_tiles, num_p)
    clamp_needed = (num_tiles % num_p) != 0          # out-of-range tile ids exist
    apply_mask = clamp_needed or (rows % tr) != 0
    max_tile = num_tiles - 1

    def in_map(c, i):
        t = c * tiles_per_core + i
        if clamp_needed:
            t = jnp.minimum(t, max_tile)  # re-reads last tile; kernel masks it
        return (t, 0)

    kernel = functools.partial(
        _mae_partial_kernel,
        tile_rows=tr,
        tiles_per_core=tiles_per_core,
        total_rows=rows,
        apply_mask=apply_mask,
    )

    in_bytes = p2d.size * p2d.dtype.itemsize + t2d.size * t2d.dtype.itemsize
    partials = pl.pallas_call(
        kernel,
        out_shape=jax.ShapeDtypeStruct((num_p, 8, LANES), jnp.float32),
        grid_spec=pltpu.PrefetchScalarGridSpec(
            num_scalar_prefetch=0,
            grid=(num_p, tiles_per_core),
            in_specs=[
                pl.BlockSpec((tr, LANES), in_map),
                pl.BlockSpec((tr, LANES), in_map),
            ],
            out_specs=pl.BlockSpec((1, 8, LANES), lambda c, i: (c, 0, 0)),
        ),
        compiler_params=pltpu.CompilerParams(
            dimension_semantics=("parallel", "arbitrary"),
            vmem_limit_bytes=_VMEM_LIMIT_BYTES,
        ),
        cost_estimate=pl.CostEstimate(
            flops=3 * n_main,
            transcendentals=0,
            bytes_accessed=in_bytes + num_p * 8 * LANES * 4,
        ),
    )(p2d, t2d)

    # Single tiny cross-lane reduce + mean in plain JAX.
    total = jnp.sum(partials) + tail_sum
    return (total / jnp.float32(n_elem)).astype(jnp.float32)


def _ref_mae(pred, target):
    return jnp.mean(jnp.abs(pred.astype(jnp.float32) - target.astype(jnp.float32)))


if __name__ == "__main__":
    key = jax.random.PRNGKey(0)
    keys = jax.random.split(key, 10)

    # Primary small example: (N, C, H, W) = (2, 4, 16, 16).
    pred = jax.random.normal(keys[0], (2, 4, 16, 16), dtype=jnp.float32)
    target = jax.random.normal(keys[1], (2, 4, 16, 16), dtype=jnp.float32)
    loss = mae_loss(pred, target)
    jax.block_until_ready(loss)
    assert jnp.allclose(loss, _ref_mae(pred, target), rtol=1e-5, atol=1e-6)

    # Ragged element count: exercises prefix-kernel + plain-JAX tail path.
    p2 = jax.random.normal(keys[2], (3, 5, 17, 11), dtype=jnp.float32)
    t2 = jax.random.normal(keys[3], (3, 5, 17, 11), dtype=jnp.float32)
    loss2 = mae_loss(p2, t2)
    jax.block_until_ready(loss2)
    assert jnp.allclose(loss2, _ref_mae(p2, t2), rtol=1e-5, atol=1e-6)

    # Two per-core partial sums (megacore pattern) + boundary-tile masking,
    # forced onto a small tile so it is exercised at small shapes.
    p3 = jax.random.normal(keys[4], (63, 128), dtype=jnp.float32)
    t3 = jax.random.normal(keys[5], (63, 128), dtype=jnp.float32)
    loss3 = mae_loss(p3, t3, tile_rows=16, num_partials=2)
    jax.block_until_ready(loss3)
    assert jnp.allclose(loss3, _ref_mae(p3, t3), rtol=1e-5, atol=1e-6)

    # bf16 inputs (per-tile upcast to f32 inside the kernel).
    p5 = jax.random.normal(keys[6], (2, 4, 16, 16), dtype=jnp.bfloat16)
    t5 = jax.random.normal(keys[7], (2, 4, 16, 16), dtype=jnp.bfloat16)
    loss5 = mae_loss(p5, t5)
    jax.block_until_ready(loss5)
    assert jnp.allclose(loss5, _ref_mae(p5, t5), rtol=1e-4, atol=1e-5)

    # Small-input fast path (plain JAX).
    p4 = jax.random.normal(keys[8], (4, 8), dtype=jnp.float32)
    t4 = jax.random.normal(keys[9], (4, 8), dtype=jnp.float32)
    loss4 = mae_loss(p4, t4)
    jax.block_until_ready(loss4)
    assert jnp.allclose(loss4, _ref_mae(p4, t4), rtol=1e-5, atol=1e-6)

    print("KERNEL_OK")
</pallas_src>

<mosaic_0001>
module attributes {stable_mosaic.version = 11 : i64} {
  func.func @_mae_partial_kernel(%arg0: i32, %arg1: i32, %arg2: memref<16x128xf32, #tpu.memory_space<vmem>>, %arg3: memref<16x128xf32, #tpu.memory_space<vmem>>, %arg4: memref<1x8x128xf32, #tpu.memory_space<vmem>>) attributes {dimension_semantics = [#tpu.dimension_semantics<parallel>, #tpu.dimension_semantics<arbitrary>], iteration_bounds = array<i64: 1, 1>, scalar_prefetch = 0 : i64, scratch_operands = 0 : i64, tpu.core_type = #tpu.core_type<tc>, window_params = [{transform_indices = @transform_0, window_bounds = array<i64: 16, 128>}, {transform_indices = @transform_1, window_bounds = array<i64: 16, 128>}, {transform_indices = @transform_2, window_bounds = array<i64: 1, 8, 128>}]} {
    %c0_i32 = arith.constant 0 : i32
    %0 = arith.cmpi eq, %arg1, %c0_i32 : i32
    %1 = arith.extui %0 : i1 to i32
    %c0_i32_0 = arith.constant 0 : i32
    %2 = arith.cmpi ne, %1, %c0_i32_0 : i32
    scf.if %2 {
      %cst_10 = arith.constant 0.000000e+00 : f32
      %13 = vector.broadcast %cst_10 : f32 to vector<1x8x128xf32>
      %c0_11 = arith.constant 0 : index
      %c0_12 = arith.constant 0 : index
      %c0_13 = arith.constant 0 : index
      %14 = vector.load %arg4[%c0_11, %c0_12, %c0_13] : memref<1x8x128xf32, #tpu.memory_space<vmem>>, vector<1x8x128xf32>
      tpu.vector_store %arg4[%c0_11, %c0_12, %c0_13], %13 {strides = array<i32>} : memref<1x8x128xf32, #tpu.memory_space<vmem>>, vector<1x8x128xf32>,
    } else {
    }
    %c0 = arith.constant 0 : index
    %c0_1 = arith.constant 0 : index
    %3 = vector.load %arg2[%c0, %c0_1] : memref<16x128xf32, #tpu.memory_space<vmem>>, vector<16x128xf32>
    %c0_2 = arith.constant 0 : index
    %c0_3 = arith.constant 0 : index
    %4 = vector.load %arg3[%c0_2, %c0_3] : memref<16x128xf32, #tpu.memory_space<vmem>>, vector<16x128xf32>
    %5 = arith.subf %3, %4 : vector<16x128xf32>
    %6 = math.absf %5 : vector<16x128xf32>
    %c0_4 = arith.constant 0 : index
    %c0_5 = arith.constant 0 : index
    %c0_6 = arith.constant 0 : index
    %7 = vector.load %arg4[%c0_4, %c0_5, %c0_6] : memref<1x8x128xf32, #tpu.memory_space<vmem>>, vector<1x8x128xf32>
    %8 = vector.shape_cast %6 : vector<16x128xf32> to vector<2x8x128xf32>
    %cst = arith.constant dense<0.000000e+00> : vector<8x128xf32>
    %9 = vector.multi_reduction <add>, %8, %cst [0] : vector<2x8x128xf32> to vector<8x128xf32>
    %10 = vector.shape_cast %9 : vector<8x128xf32> to vector<1x8x128xf32>
    %11 = arith.addf %7, %10 : vector<1x8x128xf32>
    %c0_7 = arith.constant 0 : index
    %c0_8 = arith.constant 0 : index
    %c0_9 = arith.constant 0 : index
    %12 = vector.load %arg4[%c0_7, %c0_8, %c0_9] : memref<1x8x128xf32, #tpu.memory_space<vmem>>, vector<1x8x128xf32>
    tpu.vector_store %arg4[%c0_7, %c0_8, %c0_9], %11 {strides = array<i32>} : memref<1x8x128xf32, #tpu.memory_space<vmem>>, vector<1x8x128xf32>,
    return
  }
  func.func @transform_0(%arg0: i32, %arg1: i32) -> (i32, i32) {
    %c1_i32 = arith.constant 1 : i32
    %0 = arith.muli %arg0, %c1_i32 : i32
    %1 = arith.addi %0, %arg1 : i32
    %c0_i32 = arith.constant 0 : i32
    %c0_i32_0 = arith.constant 0 : i32
    return %1, %c0_i32 : i32, i32
  }
  func.func @transform_1(%arg0: i32, %arg1: i32) -> (i32, i32) {
    %c1_i32 = arith.constant 1 : i32
    %0 = arith.muli %arg0, %c1_i32 : i32
    %1 = arith.addi %0, %arg1 : i32
    %c0_i32 = arith.constant 0 : i32
    %c0_i32_0 = arith.constant 0 : i32
    return %1, %c0_i32 : i32, i32
  }
  func.func @transform_2(%arg0: i32, %arg1: i32) -> (i32, i32, i32) {
    %c0_i32 = arith.constant 0 : i32
    %c0_i32_0 = arith.constant 0 : i32
    %c0_i32_1 = arith.constant 0 : i32
    return %arg0, %c0_i32, %c0_i32_0 : i32, i32, i32
  }
}

</mosaic_0001>

<bundles_post_ra>
// kernel: mae_loss.1
= control target key start
LH: loop header
LB: loop body
LE: loop exit
PB: predicated region body
PF: predicated region fallthrough
CT: control target
= control target key end

     0   :  { %s119_s0 = inlined_call_operand.vmem [shape: f32[16,128], index: 0, kind: input, shape index: {}]   ;;  %s120_s1 = inlined_call_operand.vmem [shape: f32[16,128], index: 1, kind: input, shape index: {}]   ;;  %s121_s2 = inlined_call_operand.vmem [shape: f32[1,8,128], index: 2, kind: output, shape index: {}]  }
   0x1   :  { %v60_v0 = vld [vmem:[%s119_s0] sm:$0xff]  ;;  %v61_v1 = vld [vmem:[%s119_s0 + $0x8] sm:$0xff] }
   0x2   :  { %v62_v2 = vld [vmem:[%s120_s1] sm:$0xff]  ;;  %v63_v3 = vld [vmem:[%s120_s1 + $0x8] sm:$0xff] }
   0x3   :  { %v64_v4 = vsub.f32 %v60_v0, %v62_v2  ;;  %v65_v5 = vsub.f32 %v61_v1, %v63_v3 }
   0x5   :  { %v66_v6 = vand.u32 2147483647, %v64_v4  ;;  %v67_v7 = vand.u32 2147483647, %v65_v5 }
   0x7   :  { %v69_v8 = vadd.f32 %v67_v7, %v66_v6 }
   0x9   :  { %71 = vst [vmem:[%s121_s2] sm:$0xff] %v69_v8 }

</bundles_post_ra>
